<compile_context>
chip_gen: v7x
topology: tpu7x:2x2x1
jax: 0.10.0
libtpu: 0.0.40
codegen_flags: <defaults>
</compile_context>

<pallas_src>
import functools

import numpy as np
import jax
import jax.numpy as jnp
from jax.experimental import pallas as pl
from jax.experimental.pallas import tpu as pltpu

FILTER_SIZES = (3, 4, 5)
KMAX = max(FILTER_SIZES)
LANE = 128
SUBLANE = 8


def _round_up(x, m):
    return ((x + m - 1) // m) * m


def cnn_kernel(ids_ref, table_ref, wc_ref, bc_ref, limit_ref, wl_ref, bl_ref,
               out_ref, xbuf, sem, *, seq_len, padded_len):
    L = seq_len
    Lp = padded_len                       # per-sequence rows, multiple of 8
    B, O = out_ref.shape
    n_taps, E, Cpad = wc_ref.shape        # (KMAX, embed_dim, lane-padded 3F)
    N = B * Lp                            # conv rows (all window starts, padded)

    # Zero the gather buffer so pad / tail rows contribute nothing (and stay finite).
    xbuf[...] = jnp.zeros_like(xbuf)

    # ---- Embedding gather: table stays in HBM; one small row DMA per token. ----
    # Issue every row copy first, then wait on all of them (shared DMA semaphore).
    for b in range(B):                    # static, small
        base = b * Lp

        @pl.loop(0, L)
        def _start(t, b=b, base=base):
            idx = ids_ref[b, t]
            pltpu.make_async_copy(table_ref.at[pl.ds(idx, 1)],
                                  xbuf.at[pl.ds(base + t, 1)], sem).start()

    for b in range(B):
        base = b * Lp

        @pl.loop(0, L)
        def _wait(t, b=b, base=base):
            idx = ids_ref[b, t]
            pltpu.make_async_copy(table_ref.at[pl.ds(idx, 1)],
                                  xbuf.at[pl.ds(base + t, 1)], sem).wait()

    # ---- Conv as KMAX accumulated tap matmuls (no materialized im2col). ----
    # conv[p, :] = sum_j x[p + j, :] @ Wc[j]   (Wc zero-padded per bank beyond its k)
    acc = jnp.dot(xbuf[pl.ds(0, N), :], wc_ref[0],
                  preferred_element_type=jnp.float32)
    for j in range(1, n_taps):
        acc = acc + jnp.dot(xbuf[pl.ds(j, N), :], wc_ref[j],
                            preferred_element_type=jnp.float32)
    conv = jnp.maximum(acc + bc_ref[...], 0.0)            # bias + ReLU, (N, Cpad)

    # ---- Mask invalid window starts, then global max pool per sequence. ----
    # valid[t, c] iff t <= L - k(bank(c)). Replacing invalid entries with 0 is safe
    # under the max because post-ReLU values are >= 0 and each bank has at least
    # one valid start (L >= KMAX asserted in the wrapper).
    t_idx = jax.lax.broadcasted_iota(jnp.int32, (Lp, Cpad), 0)
    valid = t_idx <= limit_ref[...]                       # (Lp, Cpad)
    conv3 = conv.reshape(B, Lp, Cpad)
    pooled = jnp.max(jnp.where(valid[None, :, :], conv3, 0.0), axis=1)  # (B, Cpad)

    # Dropout(0.5) is identity in eval mode.
    logits = jnp.dot(pooled, wl_ref[...],
                     preferred_element_type=jnp.float32) + bl_ref[...]  # (B, O)

    # Softmax over last dim (nn.Softmax() on a 2-D input).
    m = jnp.max(logits, axis=-1, keepdims=True)
    e = jnp.exp(logits - m)
    out_ref[...] = e / jnp.sum(e, axis=-1, keepdims=True)


def _pack_conv_params(params, cpad):
    """Zero-pad each bank to KMAX taps, concat along filters, pad lanes to cpad."""
    ws, bs = [], []
    for k in FILTER_SIZES:
        w = params[f"conv{k}_w"]                              # (k, E, F)
        ws.append(jnp.pad(w, ((0, KMAX - k), (0, 0), (0, 0))))
        bs.append(params[f"conv{k}_b"])                       # (1, F)
    wc = jnp.concatenate(ws, axis=-1)                         # (KMAX, E, 3F)
    bc = jnp.concatenate(bs, axis=-1)                         # (1, 3F)
    f3 = wc.shape[-1]
    wc = jnp.pad(wc, ((0, 0), (0, 0), (0, cpad - f3)))        # (KMAX, E, Cpad)
    bc = jnp.pad(bc, ((0, 0), (0, cpad - f3)))                # (1, Cpad)
    wl = jnp.pad(params["lin_w"], ((0, cpad - f3), (0, 0)))   # (Cpad, O)
    return wc, bc, wl


@jax.jit
def cnn_forward(token_ids, params):
    B, L = token_ids.shape
    V, E = params["embed"].shape
    F = params["conv3_b"].shape[-1]
    O = params["lin_b"].shape[-1]
    assert L >= KMAX, "need at least one valid window per filter size"

    F3 = len(FILTER_SIZES) * F
    Cpad = _round_up(F3, LANE)           # lane-dense conv block (96 -> 128 here)
    Lp = _round_up(L, SUBLANE)           # sublane-aligned per-sequence rows
    N = B * Lp
    Nx = _round_up(N + KMAX - 1, SUBLANE)  # gather buffer rows incl. tail pad

    wc, bc, wl = _pack_conv_params(params, Cpad)
    bl = params["lin_b"]
    table = params["embed"].astype(jnp.float32)
    ids = token_ids.astype(jnp.int32)

    # Per-column valid-window limit: columns of bank g (filter size k) are valid
    # window starts at positions t <= L - k; padded columns get -1 (never valid).
    limit_np = np.full((1, Cpad), -1, dtype=np.int32)
    for g, k in enumerate(FILTER_SIZES):
        limit_np[0, g * F:(g + 1) * F] = L - k
    limit = jnp.asarray(limit_np)

    kernel = functools.partial(cnn_kernel, seq_len=L, padded_len=Lp)

    flops = 2 * N * KMAX * E * Cpad + 2 * B * Cpad * O
    bytes_accessed = (ids.size * 4 + B * L * E * 4 + wc.size * 4 + bc.size * 4
                      + limit.size * 4 + wl.size * 4 + bl.size * 4 + B * O * 4)
    cost = pl.CostEstimate(flops=flops, transcendentals=B * O,
                           bytes_accessed=bytes_accessed)

    smem = pl.BlockSpec(memory_space=pltpu.MemorySpace.SMEM)
    vmem = pl.BlockSpec(memory_space=pltpu.MemorySpace.VMEM)
    hbm = pl.BlockSpec(memory_space=pl.ANY)   # embedding table stays in HBM

    return pl.pallas_call(
        kernel,
        out_shape=jax.ShapeDtypeStruct((B, O), jnp.float32),
        in_specs=[smem, hbm, vmem, vmem, vmem, vmem, vmem],
        out_specs=vmem,
        scratch_shapes=[pltpu.VMEM((Nx, E), jnp.float32),
                        pltpu.SemaphoreType.DMA(())],
        compiler_params=pltpu.CompilerParams(vmem_limit_bytes=32 * 1024 * 1024),
        cost_estimate=cost,
    )(ids, table, wc, bc, limit, wl, bl)


def reference(token_ids, params):
    """Pure-JAX reference mirroring the PyTorch forward (eval mode)."""
    embed = jnp.take(params["embed"], token_ids, axis=0).astype(jnp.float32)
    B, L, _ = embed.shape
    feats = []
    for k in FILTER_SIZES:
        w = params[f"conv{k}_w"]          # (k, E, F)
        bias = params[f"conv{k}_b"]       # (1, F)
        Lout = L - k + 1
        windows = jnp.stack([embed[:, j:j + Lout, :] for j in range(k)], axis=2)
        conv = jnp.einsum("blke,kef->blf", windows, w) + bias[None, :, :]
        conv = jnp.maximum(conv, 0.0)
        feats.append(jnp.max(conv, axis=1))
    feat = jnp.concatenate(feats, axis=1)
    logits = feat @ params["lin_w"] + params["lin_b"]
    return jax.nn.softmax(logits, axis=-1)


if __name__ == "__main__":
    # Small shapes consistent with the module's forward.
    vocab, E = 50, 32          # pretrained embedding table: (vocab, embed_dim)
    B, L = 2, 16               # inputs: (batch_size, seq_len) token ids
    F = 32                     # num_filters
    O = 5                      # num_outputs

    key = jax.random.PRNGKey(0)
    keys = jax.random.split(key, 12)

    params = {
        "embed": jax.random.normal(keys[0], (vocab, E), jnp.float32),
        "lin_w": 0.1 * jax.random.normal(keys[8], (len(FILTER_SIZES) * F, O),
                                         jnp.float32),
        "lin_b": 0.1 * jax.random.normal(keys[9], (1, O), jnp.float32),
    }
    for i, k in enumerate(FILTER_SIZES):
        params[f"conv{k}_w"] = 0.1 * jax.random.normal(
            keys[1 + 2 * i], (k, E, F), jnp.float32)
        params[f"conv{k}_b"] = 0.1 * jax.random.normal(
            keys[2 + 2 * i], (1, F), jnp.float32)

    token_ids = jax.random.randint(keys[10], (B, L), 0, vocab, dtype=jnp.int32)

    out = jax.block_until_ready(cnn_forward(token_ids, params))
    ref = reference(token_ids, params)

    assert out.shape == (B, O), out.shape
    assert jnp.allclose(out, ref, atol=1e-4, rtol=1e-4), (out, ref)
    assert jnp.allclose(jnp.sum(out, axis=-1), 1.0, atol=1e-4)

    print("KERNEL_OK")
</pallas_src>

<mosaic_0001>
module attributes {stable_mosaic.version = 11 : i64} {
  func.func @cnn_kernel(%arg0: memref<2x16xi32, #tpu.memory_space<smem>>, %arg1: memref<50x32xf32, #tpu.memory_space<any>>, %arg2: memref<5x32x128xf32, #tpu.memory_space<vmem>>, %arg3: memref<1x128xf32, #tpu.memory_space<vmem>>, %arg4: memref<1x128xi32, #tpu.memory_space<vmem>>, %arg5: memref<128x5xf32, #tpu.memory_space<vmem>>, %arg6: memref<1x5xf32, #tpu.memory_space<vmem>>, %arg7: memref<2x5xf32, #tpu.memory_space<vmem>>, %arg8: memref<40x32xf32, #tpu.memory_space<vmem>>, %arg9: memref<!tpu.dma_semaphore, #tpu.memory_space<semaphore_mem>>) attributes {dimension_semantics = [], scalar_prefetch = 0 : i64, scratch_operands = 2 : i64, tpu.core_type = #tpu.core_type<tc>} {
    %cst = arith.constant 0.000000e+00 : f32
    %0 = vector.broadcast %cst : f32 to vector<40x32xf32>
    %c0 = arith.constant 0 : index
    %c0_0 = arith.constant 0 : index
    %1 = vector.load %arg8[%c0, %c0_0] : memref<40x32xf32, #tpu.memory_space<vmem>>, vector<40x32xf32>
    tpu.vector_store %arg8[%c0, %c0_0], %0 {strides = array<i32>} : memref<40x32xf32, #tpu.memory_space<vmem>>, vector<40x32xf32>,
    %c0_i32 = arith.constant 0 : i32
    %c16_i32 = arith.constant 16 : i32
    %2 = arith.addi %c0_i32, %c16_i32 : i32
    %c1_i32 = arith.constant 1 : i32
    scf.for %arg10 = %c0_i32 to %2 step %c1_i32  : i32 {
      %c1_i32_56 = arith.constant 1 : i32
      %61 = arith.muli %arg10, %c1_i32_56 : i32
      %c0_i32_57 = arith.constant 0 : i32
      %62 = arith.addi %c0_i32_57, %61 : i32
      %c0_58 = arith.constant 0 : index
      %63 = arith.index_cast %62 : i32 to index
      %64 = memref.load %arg0[%c0_58, %63] : memref<2x16xi32, #tpu.memory_space<smem>>
      %c0_i32_59 = arith.constant 0 : i32
      %65 = arith.addi %c0_i32_59, %62 : i32
      %c0_i32_60 = arith.constant 0 : i32
      %66 = tpu.memref_slice %arg1[%64, %c0_i32_60] : memref<50x32xf32, #tpu.memory_space<any>> -> memref<1x32xf32, #tpu.memory_space<any>>
      %c0_i32_61 = arith.constant 0 : i32
      %67 = tpu.memref_slice %arg8[%65, %c0_i32_61] : memref<40x32xf32, #tpu.memory_space<vmem>> -> memref<1x32xf32, #tpu.memory_space<vmem>>
      tpu.enqueue_dma source(%66 : memref<1x32xf32, #tpu.memory_space<any>>) target(%67 : memref<1x32xf32, #tpu.memory_space<vmem>>) target_semaphore(%arg9 : memref<!tpu.dma_semaphore, #tpu.memory_space<semaphore_mem>>)
    }
    %c16_i32_1 = arith.constant 16 : i32
    %c0_i32_2 = arith.constant 0 : i32
    %c16_i32_3 = arith.constant 16 : i32
    %3 = arith.addi %c0_i32_2, %c16_i32_3 : i32
    %c1_i32_4 = arith.constant 1 : i32
    scf.for %arg10 = %c0_i32_2 to %3 step %c1_i32_4  : i32 {
      %c1_i32_56 = arith.constant 1 : i32
      %61 = arith.muli %arg10, %c1_i32_56 : i32
      %c0_i32_57 = arith.constant 0 : i32
      %62 = arith.addi %c0_i32_57, %61 : i32
      %c1_58 = arith.constant 1 : index
      %63 = arith.index_cast %62 : i32 to index
      %64 = memref.load %arg0[%c1_58, %63] : memref<2x16xi32, #tpu.memory_space<smem>>
      %c16_i32_59 = arith.constant 16 : i32
      %65 = arith.addi %c16_i32_59, %62 : i32
      %c0_i32_60 = arith.constant 0 : i32
      %66 = tpu.memref_slice %arg1[%64, %c0_i32_60] : memref<50x32xf32, #tpu.memory_space<any>> -> memref<1x32xf32, #tpu.memory_space<any>>
      %c0_i32_61 = arith.constant 0 : i32
      %67 = tpu.memref_slice %arg8[%65, %c0_i32_61] : memref<40x32xf32, #tpu.memory_space<vmem>> -> memref<1x32xf32, #tpu.memory_space<vmem>>
      tpu.enqueue_dma source(%66 : memref<1x32xf32, #tpu.memory_space<any>>) target(%67 : memref<1x32xf32, #tpu.memory_space<vmem>>) target_semaphore(%arg9 : memref<!tpu.dma_semaphore, #tpu.memory_space<semaphore_mem>>)
    }
    %c16_i32_5 = arith.constant 16 : i32
    %c0_i32_6 = arith.constant 0 : i32
    %c16_i32_7 = arith.constant 16 : i32
    %4 = arith.addi %c0_i32_6, %c16_i32_7 : i32
    %c1_i32_8 = arith.constant 1 : i32
    scf.for %arg10 = %c0_i32_6 to %4 step %c1_i32_8  : i32 {
      %c1_i32_56 = arith.constant 1 : i32
      %61 = arith.muli %arg10, %c1_i32_56 : i32
      %c0_i32_57 = arith.constant 0 : i32
      %62 = arith.addi %c0_i32_57, %61 : i32
      %c0_58 = arith.constant 0 : index
      %63 = arith.index_cast %62 : i32 to index
      %64 = memref.load %arg0[%c0_58, %63] : memref<2x16xi32, #tpu.memory_space<smem>>
      %c0_i32_59 = arith.constant 0 : i32
      %65 = arith.addi %c0_i32_59, %62 : i32
      %c0_i32_60 = arith.constant 0 : i32
      %66 = tpu.memref_slice %arg1[%64, %c0_i32_60] : memref<50x32xf32, #tpu.memory_space<any>> -> memref<1x32xf32, #tpu.memory_space<any>>
      %c0_i32_61 = arith.constant 0 : i32
      %67 = tpu.memref_slice %arg8[%65, %c0_i32_61] : memref<40x32xf32, #tpu.memory_space<vmem>> -> memref<1x32xf32, #tpu.memory_space<vmem>>
      tpu.wait_dma2 semaphore(%arg9 : memref<!tpu.dma_semaphore, #tpu.memory_space<semaphore_mem>>) src(%66 : memref<1x32xf32, #tpu.memory_space<any>>) dst(%67 : memref<1x32xf32, #tpu.memory_space<vmem>>)
    }
    %c16_i32_9 = arith.constant 16 : i32
    %c0_i32_10 = arith.constant 0 : i32
    %c16_i32_11 = arith.constant 16 : i32
    %5 = arith.addi %c0_i32_10, %c16_i32_11 : i32
    %c1_i32_12 = arith.constant 1 : i32
    scf.for %arg10 = %c0_i32_10 to %5 step %c1_i32_12  : i32 {
      %c1_i32_56 = arith.constant 1 : i32
      %61 = arith.muli %arg10, %c1_i32_56 : i32
      %c0_i32_57 = arith.constant 0 : i32
      %62 = arith.addi %c0_i32_57, %61 : i32
      %c1_58 = arith.constant 1 : index
      %63 = arith.index_cast %62 : i32 to index
      %64 = memref.load %arg0[%c1_58, %63] : memref<2x16xi32, #tpu.memory_space<smem>>
      %c16_i32_59 = arith.constant 16 : i32
      %65 = arith.addi %c16_i32_59, %62 : i32
      %c0_i32_60 = arith.constant 0 : i32
      %66 = tpu.memref_slice %arg1[%64, %c0_i32_60] : memref<50x32xf32, #tpu.memory_space<any>> -> memref<1x32xf32, #tpu.memory_space<any>>
      %c0_i32_61 = arith.constant 0 : i32
      %67 = tpu.memref_slice %arg8[%65, %c0_i32_61] : memref<40x32xf32, #tpu.memory_space<vmem>> -> memref<1x32xf32, #tpu.memory_space<vmem>>
      tpu.wait_dma2 semaphore(%arg9 : memref<!tpu.dma_semaphore, #tpu.memory_space<semaphore_mem>>) src(%66 : memref<1x32xf32, #tpu.memory_space<any>>) dst(%67 : memref<1x32xf32, #tpu.memory_space<vmem>>)
    }
    %c16_i32_13 = arith.constant 16 : i32
    %c0_14 = arith.constant 0 : index
    %c0_15 = arith.constant 0 : index
    %6 = vector.load %arg8[%c0_14, %c0_15] : memref<40x32xf32, #tpu.memory_space<vmem>>, vector<32x32xf32>
    %c0_16 = arith.constant 0 : index
    %c0_17 = arith.constant 0 : index
    %c0_18 = arith.constant 0 : index
    %7 = vector.load %arg2[%c0_16, %c0_17, %c0_18] : memref<5x32x128xf32, #tpu.memory_space<vmem>>, vector<1x32x128xf32>
    %8 = vector.shape_cast %7 : vector<1x32x128xf32> to vector<32x128xf32>
    %cst_19 = arith.constant dense<0.000000e+00> : vector<32x128xf32>
    %9 = tpu.matmul %6, %8, %cst_19 {dimension_numbers = #tpu.dot_dimension_numbers<[1], [0], [0], [1], [0, 0, 1, 1], [], []>} : vector<32x32xf32>, vector<32x128xf32>, vector<32x128xf32> -> vector<32x128xf32>
    %c1 = arith.constant 1 : index
    %c0_20 = arith.constant 0 : index
    %10 = vector.load %arg8[%c1, %c0_20] : memref<40x32xf32, #tpu.memory_space<vmem>>, vector<32x32xf32>
    %c1_21 = arith.constant 1 : index
    %c0_22 = arith.constant 0 : index
    %c0_23 = arith.constant 0 : index
    %11 = vector.load %arg2[%c1_21, %c0_22, %c0_23] : memref<5x32x128xf32, #tpu.memory_space<vmem>>, vector<1x32x128xf32>
    %12 = vector.shape_cast %11 : vector<1x32x128xf32> to vector<32x128xf32>
    %cst_24 = arith.constant dense<0.000000e+00> : vector<32x128xf32>
    %13 = tpu.matmul %10, %12, %cst_24 {dimension_numbers = #tpu.dot_dimension_numbers<[1], [0], [0], [1], [0, 0, 1, 1], [], []>} : vector<32x32xf32>, vector<32x128xf32>, vector<32x128xf32> -> vector<32x128xf32>
    %14 = arith.addf %9, %13 : vector<32x128xf32>
    %c2 = arith.constant 2 : index
    %c0_25 = arith.constant 0 : index
    %15 = vector.load %arg8[%c2, %c0_25] : memref<40x32xf32, #tpu.memory_space<vmem>>, vector<32x32xf32>
    %c2_26 = arith.constant 2 : index
    %c0_27 = arith.constant 0 : index
    %c0_28 = arith.constant 0 : index
    %16 = vector.load %arg2[%c2_26, %c0_27, %c0_28] : memref<5x32x128xf32, #tpu.memory_space<vmem>>, vector<1x32x128xf32>
    %17 = vector.shape_cast %16 : vector<1x32x128xf32> to vector<32x128xf32>
    %cst_29 = arith.constant dense<0.000000e+00> : vector<32x128xf32>
    %18 = tpu.matmul %15, %17, %cst_29 {dimension_numbers = #tpu.dot_dimension_numbers<[1], [0], [0], [1], [0, 0, 1, 1], [], []>} : vector<32x32xf32>, vector<32x128xf32>, vector<32x128xf32> -> vector<32x128xf32>
    %19 = arith.addf %14, %18 : vector<32x128xf32>
    %c3 = arith.constant 3 : index
    %c0_30 = arith.constant 0 : index
    %20 = vector.load %arg8[%c3, %c0_30] : memref<40x32xf32, #tpu.memory_space<vmem>>, vector<32x32xf32>
    %c3_31 = arith.constant 3 : index
    %c0_32 = arith.constant 0 : index
    %c0_33 = arith.constant 0 : index
    %21 = vector.load %arg2[%c3_31, %c0_32, %c0_33] : memref<5x32x128xf32, #tpu.memory_space<vmem>>, vector<1x32x128xf32>
    %22 = vector.shape_cast %21 : vector<1x32x128xf32> to vector<32x128xf32>
    %cst_34 = arith.constant dense<0.000000e+00> : vector<32x128xf32>
    %23 = tpu.matmul %20, %22, %cst_34 {dimension_numbers = #tpu.dot_dimension_numbers<[1], [0], [0], [1], [0, 0, 1, 1], [], []>} : vector<32x32xf32>, vector<32x128xf32>, vector<32x128xf32> -> vector<32x128xf32>
    %24 = arith.addf %19, %23 : vector<32x128xf32>
    %c4 = arith.constant 4 : index
    %c0_35 = arith.constant 0 : index
    %25 = vector.load %arg8[%c4, %c0_35] : memref<40x32xf32, #tpu.memory_space<vmem>>, vector<32x32xf32>
    %c4_36 = arith.constant 4 : index
    %c0_37 = arith.constant 0 : index
    %c0_38 = arith.constant 0 : index
    %26 = vector.load %arg2[%c4_36, %c0_37, %c0_38] : memref<5x32x128xf32, #tpu.memory_space<vmem>>, vector<1x32x128xf32>
    %27 = vector.shape_cast %26 : vector<1x32x128xf32> to vector<32x128xf32>
    %cst_39 = arith.constant dense<0.000000e+00> : vector<32x128xf32>
    %28 = tpu.matmul %25, %27, %cst_39 {dimension_numbers = #tpu.dot_dimension_numbers<[1], [0], [0], [1], [0, 0, 1, 1], [], []>} : vector<32x32xf32>, vector<32x128xf32>, vector<32x128xf32> -> vector<32x128xf32>
    %29 = arith.addf %24, %28 : vector<32x128xf32>
    %c0_40 = arith.constant 0 : index
    %c0_41 = arith.constant 0 : index
    %30 = vector.load %arg3[%c0_40, %c0_41] : memref<1x128xf32, #tpu.memory_space<vmem>>, vector<1x128xf32>
    %31 = vector.broadcast %30 : vector<1x128xf32> to vector<32x128xf32>
    %32 = arith.addf %29, %31 : vector<32x128xf32>
    %cst_42 = arith.constant 0.000000e+00 : f32
    %33 = vector.broadcast %cst_42 : f32 to vector<32x128xf32>
    %34 = arith.maximumf %32, %33 : vector<32x128xf32>
    %35 = tpu.iota {dimensions = array<i32: 0>} : vector<16x128xi32>
    %c0_43 = arith.constant 0 : index
    %c0_44 = arith.constant 0 : index
    %36 = vector.load %arg4[%c0_43, %c0_44] : memref<1x128xi32, #tpu.memory_space<vmem>>, vector<1x128xi32>
    %37 = vector.broadcast %36 : vector<1x128xi32> to vector<16x128xi32>
    %38 = arith.cmpi sle, %35, %37 : vector<16x128xi32>
    %39 = vector.shape_cast %34 : vector<32x128xf32> to vector<2x16x128xf32>
    %40 = vector.shape_cast %38 : vector<16x128xi1> to vector<1x16x128xi1>
    %cst_45 = arith.constant 0.000000e+00 : f32
    %41 = vector.shape_cast %40 : vector<1x16x128xi1> to vector<1x16x128xi1>
    %42 = vector.broadcast %41 : vector<1x16x128xi1> to vector<2x16x128xi1>
    %43 = vector.broadcast %cst_45 : f32 to vector<2x16x128xf32>
    %44 = arith.select %42, %39, %43 : vector<2x16x128xi1>, vector<2x16x128xf32>
    %cst_46 = arith.constant dense<0xFF800000> : vector<2x128xf32>
    %45 = vector.multi_reduction <maximumf>, %44, %cst_46 [1] : vector<2x16x128xf32> to vector<2x128xf32>
    %c0_47 = arith.constant 0 : index
    %c0_48 = arith.constant 0 : index
    %46 = vector.load %arg5[%c0_47, %c0_48] : memref<128x5xf32, #tpu.memory_space<vmem>>, vector<128x5xf32>
    %cst_49 = arith.constant dense<0.000000e+00> : vector<2x5xf32>
    %47 = tpu.matmul %45, %46, %cst_49 {dimension_numbers = #tpu.dot_dimension_numbers<[1], [0], [0], [1], [0, 0, 1, 1], [], []>} : vector<2x128xf32>, vector<128x5xf32>, vector<2x5xf32> -> vector<2x5xf32>
    %c0_50 = arith.constant 0 : index
    %c0_51 = arith.constant 0 : index
    %48 = vector.load %arg6[%c0_50, %c0_51] : memref<1x5xf32, #tpu.memory_space<vmem>>, vector<1x5xf32>
    %49 = vector.broadcast %48 : vector<1x5xf32> to vector<2x5xf32>
    %50 = arith.addf %47, %49 : vector<2x5xf32>
    %cst_52 = arith.constant dense<0xFF800000> : vector<2xf32>
    %51 = vector.multi_reduction <maximumf>, %50, %cst_52 [1] : vector<2x5xf32> to vector<2xf32>
    %52 = vector.shape_cast %51 : vector<2xf32> to vector<2x1xf32>
    %53 = vector.broadcast %52 : vector<2x1xf32> to vector<2x5xf32>
    %54 = arith.subf %50, %53 : vector<2x5xf32>
    %55 = math.exp %54 : vector<2x5xf32>
    %cst_53 = arith.constant dense<0.000000e+00> : vector<2xf32>
    %56 = vector.multi_reduction <add>, %55, %cst_53 [1] : vector<2x5xf32> to vector<2xf32>
    %57 = vector.shape_cast %56 : vector<2xf32> to vector<2x1xf32>
    %58 = vector.broadcast %57 : vector<2x1xf32> to vector<2x5xf32>
    %59 = arith.divf %55, %58 : vector<2x5xf32>
    %c0_54 = arith.constant 0 : index
    %c0_55 = arith.constant 0 : index
    %60 = vector.load %arg7[%c0_54, %c0_55] : memref<2x5xf32, #tpu.memory_space<vmem>>, vector<2x5xf32>
    tpu.vector_store %arg7[%c0_54, %c0_55], %59 {strides = array<i32>} : memref<2x5xf32, #tpu.memory_space<vmem>>, vector<2x5xf32>,
    return
  }
}

</mosaic_0001>

<bundles_post_ra>
// kernel: cnn_forward.1
= control target key start
LH: loop header
LB: loop body
LE: loop exit
PB: predicated region body
PF: predicated region fallthrough
CT: control target
= control target key end

     0   :  { %12 = vsyncpa [#allocation6], 0  ;;  %s1580_s0 = inlined_call_operand.vmem [shape: s32[2,16], index: 0, kind: input, shape index: {}]   ;;  %s1581_s1 = inlined_call_operand.vmem [shape: f32[50,32], index: 1, kind: input, shape index: {}]   ;;  %s1582_s2 = inlined_call_operand.vmem [shape: f32[5,32,128], index: 2, kind: input, shape index: {}]   ;;  %s1583_s3 = inlined_call_operand.vmem [shape: f32[1,128], index: 3, kind: input, shape index: {}]   ;;  %s1584_s4 = inlined_call_operand.vmem [shape: s32[1,128], index: 4, kind: input, shape index: {}]   ;;  %s1585_s5 = inlined_call_operand.vmem [shape: f32[128,5], index: 5, kind: input, shape index: {}]   ;;  %s1586_s6 = inlined_call_operand.vmem [shape: f32[1,5], index: 6, kind: input, shape index: {}]   ;;  %s1587_s7 = inlined_call_operand.hbm [shape: f32[2,5], index: 7, kind: output, shape index: {}]  }
   0x1   :  { %13 = vsyncpa [#allocation5], 0  ;;  %s20_s26 = sshll.u32 %s1580_s0, 4  ;;  %s21_s26 = int_to_ptr.vmem [resolvable:$true] %s20_s26 }
   0x2   :  { %s1279_s27 = scalar_lea.vmem %s21_s26, 32  ;;  %p1284_p1 = scmp.lt.s32.totalorder %s21_s26, %s21_s26 }
   0x3   :  { %p1280_p0 = scmp.ne.s32.totalorder %s21_s26, %s1279_s27  ;;  %p1285_p2 = scmp.lt.s32.totalorder %s1279_s27, %s1279_s27 }
   0x5   :  { %p1286_p3 = por %p1285_p2, %p1284_p1 }
   0x7   :  { %p1287_p4 = pnand %p1286_p3, %p1280_p0 }
   0x9   :  { %1290 = shalt.err (!%p1287_p4)
}
   0xa   :  { %s1353_s28 = smov [#allocation4]  }
   0xb   :  { %23 = dma.vmem_to_smem %s21_s26, 32, %s1353_s28, [#allocation6]  }
   0xc   :  { %1329 = dma.done.wait [#allocation6], 32  }
   0xd   :  { %1330 = vsyncadd [#allocation6], 4294967264 }
   0xe   :  { %37 = sfence }
   0xf   :  { %vm38_vm0 = vcmask 261120   ;;  %v1354_v0 = vmov 0.0   ;;  %s1337_s0 = smov 0  }
  0x10   :  { %39 = vst.msk [vmem:[#allocation2] sm:$0xff] %vm38_vm0, %v1354_v0  ;;  %40 = vst.msk [vmem:[#allocation2 + $0x8] sm:$0xff] %vm38_vm0, %v1354_v0 }
  0x11   :  { %41 = vst.msk [vmem:[#allocation2 + $0x10] sm:$0xff] %vm38_vm0, %v1354_v0  ;;  %42 = vst.msk [vmem:[#allocation2 + $0x18] sm:$0xff] %vm38_vm0, %v1354_v0 }
  0x12   :  { %43 = vst.msk [vmem:[#allocation2 + $0x20] sm:$0xff] %vm38_vm0, %v1354_v0 }
  0x13 LB: > { %s50_s29 = sld [smem:[#allocation4 + %s1339_s0]]  ;;  %s52_s10 = scalar_lea.vmem [#allocation2], %s1339_s0  ;;  %s1339_s0 = sphi %s1337_s0, %s49_s0  }
  0x19   : > { %s51_s9 = scalar_lea.vmem %s1581_s1, %s50_s29 }
  0x1a   : > { %v70_v1 = vld [vmem:[%s51_s9] sm:$0x1] }
  0x1b   : > { %71 = vst [vmem:[%s52_s10] sm:$0x1] %v70_v1 }
  0x1c   : > { %96 = vsyncadd [#allocation3], 16  ;;  %s49_s0 = sadd.s32 1, %s1339_s0  }
  0x1d   : > { %p46_p5 = scmp.ge.s32.totalorder %s49_s0, 16  }
  0x1e   :  { %s1341_s11 = smov (%p46_p5), 0  }
  0x1f   :  { %48 = sbr.rel (!%p46_p5) target bundleno = 19 (0x13), region = 164 }
  0x26 LB: > { %s103_s12 = sshra.s32 %s1343_s11, 7  ;;  %s108_s13 = sand.u32 127, %s1343_s11  ;;  %s1343_s11 = sphi %s1341_s11, %s102_s11  }
  0x27   : > { %s994_s14 = sshll.u32 %s103_s12, 7  ;;  %s910_s21 = scalar_lea.vmem [#allocation2], %s1343_s11 }
  0x28   : > { %s995_s15 = sadd.s32 128, %s994_s14 }
  0x29   : > { %s109_s16 = sadd.s32 %s995_s15, %s108_s13 }
  0x2a   : > { %s110_s17 = sld [smem:[#allocation4 + %s109_s16]] }
  0x30   : > { %s112_s20 = scalar_lea.vmem %s1581_s1, %s110_s17 }
  0x31   : > { %v131_v2 = vld [vmem:[%s112_s20] sm:$0x1] }
  0x32   : > { %953 = vst [vmem:[%s910_s21 + $0x10] sm:$0x1] %v131_v2 }
  0x33   : > { %157 = vsyncadd [#allocation3], 16  ;;  %s102_s11 = sadd.s32 1, %s1343_s11  }
  0x34   : > { %p99_p6 = scmp.ge.s32.totalorder %s102_s11, 16  }
  0x35   :  { %s1345_s22 = smov (%p99_p6), 0  }
  0x36   :  { %101 = sbr.rel (!%p99_p6) target bundleno = 38 (0x26), region = 175 }
  0x3d LB: > { %1331 = dma.done.wait [#allocation3], 16  ;;  %s1347_s22 = sphi %s1345_s22, %s163_s22  }
  0x3e   : > { %1332 = vsyncadd [#allocation3], 4294967280  ;;  %s163_s22 = sadd.s32 1, %s1347_s22  }
  0x3f   : > { %p160_p7 = scmp.ge.s32.totalorder %s163_s22, 16  }
  0x40   :  { %s1349_s23 = smov (%p160_p7), 0  }
  0x41   :  { %162 = sbr.rel (!%p160_p7) target bundleno = 61 (0x3d), region = 186 }
  0x48 LB: > { %1333 = dma.done.wait [#allocation3], 16  ;;  %s1351_s23 = sphi %s1349_s23, %s173_s23  }
  0x49   : > { %1334 = vsyncadd [#allocation3], 4294967280  ;;  %s173_s23 = sadd.s32 1, %s1351_s23  }
  0x4a   : > { %p170_p8 = scmp.ge.s32.totalorder %s173_s23, 16  }
  0x4b   :  { %v189_v3 = vld [vmem:[%s1582_s2] sm:$0xff] (%p170_p8)  ;;  %v190_v4 = vld [vmem:[%s1582_s2 + $0x8] sm:$0xff] (%p170_p8)  ;;  %v191_v5 = vld [vmem:[%s1582_s2 + $0x10] sm:$0xff] (%p170_p8)  ;;  %v1355_v39 = vmov (%p170_p8), 0.0|0.0   ;;  %vm1356_vm1 = vmmov (%p170_p8), 0   ;;  %vm798_vm4 = vcmask (%p170_p8), 1041409  }
  0x4c   :  { %172 = sbr.rel (!%p170_p8) target bundleno = 72 (0x48), region = 197  ;;  %v1166_v6 = vpack.c.bf16 (%p170_p8), %v190_v4, %v189_v3  ;;  %v192_v7 = vld [vmem:[%s1582_s2 + $0x18] sm:$0xff] (%p170_p8)  ;;  %v185_v8 = vld [vmem:[#allocation2] sm:$0xff] (%p170_p8)  ;;  %v967_v11 = vld [vmem:[%s1582_s2 + $0x48] sm:$0xff] (%p170_p8)  ;;  %vm871_vm5 = vcmask (%p170_p8), 33792   ;;  %s1357_s22 = smov (%p170_p8), [#allocation7]  }
  0x4d   :  { %v1170_v9 = vpack.c.bf16 (%p170_p8), %v192_v7, %v191_v5  ;;  %1075 = vmatprep.mubr.msk.f32.mxu0 (%p170_p8), %vm38_vm0, %v185_v8  ;;  %v966_v10 = vld [vmem:[%s1582_s2 + $0x40] sm:$0xff] (%p170_p8)  ;;  %v968_v13 = vld [vmem:[%s1582_s2 + $0x50] sm:$0xff] (%p170_p8)  ;;  %v969_v14 = vld [vmem:[%s1582_s2 + $0x58] sm:$0xff] (%p170_p8)  ;;  %s890_s23 = sshll.u32 (%p170_p8), %s1357_s22, 4  ;;  %s891_s23 = int_to_ptr.vmem [resolvable:$true] %s890_s23 }
  0x4e   :  { %1167 = vmatprep.subr.bf16.mxu0 (%p170_p8), %v1166_v6  ;;  %v1174_v12 = vpack.c.bf16 (%p170_p8), %v967_v11, %v966_v10  ;;  %v954_v15 = vld [vmem:[%s1582_s2 + $0x20] sm:$0xff] (%p170_p8)  ;;  %v955_v16 = vld [vmem:[%s1582_s2 + $0x28] sm:$0xff] (%p170_p8)  ;;  %v187_v19 = vld [vmem:[#allocation2 + $0x10] sm:$0xff] (%p170_p8)  ;;  %v1178_v20 = vpack.c.bf16 (%p170_p8), %v969_v14, %v968_v13  ;;  %p1296_p10 = scmp.lt.s32.totalorder (%p170_p8), %s891_s23, %s891_s23 }
  0x4f   :  { %1169 = vmatpush3.bf16.msra.mxu0 (%p170_p8), %v1166_v6  ;;  %v186_v17 = vld [vmem:[#allocation2 + $0x8] sm:$0xff] (%p170_p8)  ;;  %v1158_v18 = vpack.c.bf16 (%p170_p8), %v955_v16, %v954_v15  ;;  %v956_v21 = vld [vmem:[%s1582_s2 + $0x30] sm:$0xff] (%p170_p8)  ;;  %v957_v22 = vld [vmem:[%s1582_s2 + $0x38] sm:$0xff] (%p170_p8) }
  0x50   :  { %1171 = vmatprep.subr.bf16.mxu0 (%p170_p8), %v1170_v9  ;;  %v974_v23 = vld [vmem:[%s1582_s2 + $0x60] sm:$0xff] (%p170_p8)  ;;  %v975_v24 = vld [vmem:[%s1582_s2 + $0x68] sm:$0xff] (%p170_p8)  ;;  %v1162_v25 = vpack.c.bf16 (%p170_p8), %v957_v22, %v956_v21  ;;  %v188_v27 = vld [vmem:[#allocation2 + $0x18] sm:$0xff] (%p170_p8) }
  0x51   :  { %1159 = vmatprep.subr.bf16.mxu1 (%p170_p8), %v1158_v18  ;;  %v193_v26 = vld [vmem:[#allocation2 + $0x1] sm:$0xff] (%p170_p8)  ;;  %v1182_v29 = vpack.c.bf16 (%p170_p8), %v975_v24, %v974_v23  ;;  %v976_v30 = vld [vmem:[%s1582_s2 + $0x70] sm:$0xff] (%p170_p8)  ;;  %v977_v31 = vld [vmem:[%s1582_s2 + $0x78] sm:$0xff] (%p170_p8) }
  0x52   :  { %1161 = vmatpush3.bf16.msra.mxu1 (%p170_p8), %v1158_v18  ;;  %v396_v28 = vld [vmem:[#allocation2 + $0x2] sm:$0xff] (%p170_p8)  ;;  %1061 = vmatprep.mubr.msk.f32.mxu1 (%p170_p8), %vm38_vm0, %v193_v26  ;;  %v397_v35 = vld [vmem:[#allocation2 + $0xa] sm:$0xff] (%p170_p8)  ;;  %v398_v37 = vld [vmem:[#allocation2 + $0x12] sm:$0xff] (%p170_p8)  ;;  %v1186_v38 = vpack.c.bf16 (%p170_p8), %v977_v31, %v976_v30 }
  0x53   :  { %1173 = vmatpush3.bf16.msra.mxu0 %v1170_v9  ;;  %1163 = vmatprep.subr.bf16.mxu1 %v1162_v25  ;;  %v773_v32 = vld [vmem:[%s1585_s5] sm:$0xff]  ;;  %v774_v33 = vld [vmem:[%s1585_s5 + $0x8] sm:$0xff]  ;;  %v195_v36 = vld [vmem:[#allocation2 + $0x11] sm:$0xff] }
  0x54   :  { %1175 = vmatprep.subr.bf16.mxu0 %v1174_v12  ;;  %v194_v34 = vld [vmem:[#allocation2 + $0x9] sm:$0xff]  ;;  %v1199_v40 = vpack.c.bf16 %v774_v33, %v773_v32  ;;  %v982_v41 = vld [vmem:[%s1582_s2 + $0x80] sm:$0xff]  ;;  %v985_v48 = vld [vmem:[%s1582_s2 + $0x98] sm:$0xff] }
  0x55   :  { %v983_v42 = vld [vmem:[%s1582_s2 + $0x88] sm:$0xff]  ;;  %v196_v43 = vld [vmem:[#allocation2 + $0x19] sm:$0xff]  ;;  %v984_v47 = vld [vmem:[%s1582_s2 + $0x90] sm:$0xff] }
  0x56   :  { %1076 = vmatmul.mubr.msk.f32.vlgmr.msra.gmra.mrb[0].mxu0 %vm38_vm0, %v186_v17  ;;  %1165 = vmatpush3.bf16.msra.mxu1 %v1162_v25  ;;  %v399_v44 = vld [vmem:[#allocation2 + $0x1a] sm:$0xff]  ;;  %v506_v45 = vld [vmem:[#allocation2 + $0x3] sm:$0xff]  ;;  %v1190_v46 = vpack.c.bf16 %v983_v42, %v982_v41  ;;  %v507_v49 = vld [vmem:[#allocation2 + $0xb] sm:$0xff]  ;;  %v1194_v51 = vpack.c.bf16 %v985_v48, %v984_v47 }
  0x57   :  { %1177 = vmatpush3.bf16.msra.mxu0 %v1174_v12  ;;  %1078 = vmatprep.mubr.msk.f32.mxu0 %vm38_vm0, %v187_v19  ;;  %v508_v50 = vld [vmem:[#allocation2 + $0x13] sm:$0xff]  ;;  %v509_v52 = vld [vmem:[#allocation2 + $0x1b] sm:$0xff]  ;;  %v616_v53 = vld [vmem:[#allocation2 + $0x4] sm:$0xff]  ;;  %v741_v19 = vlaneseq }
  0x58   :  { %1179 = vmatprep.subr.bf16.mxu0 %v1178_v20  ;;  %1198 = vmatprep.subr.bf16.mxu1 %v1355_v39  ;;  %v617_v54 = vld [vmem:[#allocation2 + $0xc] sm:$0xff]  ;;  %v618_v55 = vld [vmem:[#allocation2 + $0x14] sm:$0xff]  ;;  %v619_v56 = vld [vmem:[#allocation2 + $0x1c] sm:$0xff] }
  0x59   :  { %1062 = vmatmul.mubr.msk.f32.vlgmr.msra.gmra.mrb[0].mxu1 %vm38_vm0, %v194_v34  ;;  %v775_v57 = vld [vmem:[%s1585_s5 + $0x10] sm:$0xff]  ;;  %v776_v58 = vld [vmem:[%s1585_s5 + $0x18] sm:$0xff]  ;;  %v777_v60 = vld [vmem:[%s1585_s5 + $0x20] sm:$0xff] }
  0x5a   :  { %1079 = vmatmul.mubr.msk.f32.gmra.mrb[2].mxu0 %vm38_vm0, %v188_v27  ;;  %1064 = vmatprep.mubr.msk.f32.mxu1 %vm38_vm0, %v195_v36  ;;  %v1202_v59 = vpack.c.bf16 %v776_v58, %v775_v57  ;;  %v778_v61 = vld [vmem:[%s1585_s5 + $0x28] sm:$0xff]  ;;  %v779_v63 = vld [vmem:[%s1585_s5 + $0x30] sm:$0xff]  ;;  %v780_v1 = vld [vmem:[%s1585_s5 + $0x38] sm:$0xff] }
  0x5b   :  { %1181 = vmatpush3.bf16.msra.mxu0 %v1178_v20  ;;  %1089 = vmatprep.mubr.msk.f32.mxu0 %vm38_vm0, %v396_v28  ;;  %v1205_v62 = vpack.c.bf16 %v778_v61, %v777_v60  ;;  %v1208_v2 = vpack.c.bf16 %v780_v1, %v779_v63  ;;  %v781_v3 = vld [vmem:[%s1585_s5 + $0x40] sm:$0xff]  ;;  %v782_v4 = vld [vmem:[%s1585_s5 + $0x48] sm:$0xff]  ;;  %v783_v6 = vld [vmem:[%s1585_s5 + $0x50] sm:$0xff]  ;;  %v742_v20 = vshrl.u32 %v741_v19, 7 }
  0x5c   :  { %1183 = vmatprep.subr.bf16.mxu0 %v1182_v29  ;;  %1200 = vmatpush3.bf16.msra.mxu1 %v1199_v40  ;;  %v1211_v5 = vpack.c.bf16 %v782_v4, %v781_v3  ;;  %v784_v7 = vld [vmem:[%s1585_s5 + $0x58] sm:$0xff]  ;;  %v785_v9 = vld [vmem:[%s1585_s5 + $0x60] sm:$0xff]  ;;  %v786_v10 = vld [vmem:[%s1585_s5 + $0x68] sm:$0xff] }
  0x5d   :  { %1065 = vmatmul.mubr.msk.f32.gmra.mrb[2].mxu1 %vm38_vm0, %v196_v43  ;;  %1201 = vmatprep.subr.bf16.mxu1 %v1355_v39  ;;  %v1214_v8 = vpack.c.bf16 %v784_v7, %v783_v6  ;;  %v1217_v11 = vpack.c.bf16 %v786_v10, %v785_v9  ;;  %v787_v12 = vld [vmem:[%s1585_s5 + $0x70] sm:$0xff]  ;;  %v788_v13 = vld [vmem:[%s1585_s5 + $0x78] sm:$0xff]  ;;  %v990_v22 = vld [vmem:[%s1583_s3] ss:$0 sm:$0xff]  ;;  %v743_v23 = vadd.s32 8, %v742_v20 }
  0x5e   :  { %1090 = vmatmul.mubr.msk.f32.vlgmr.msra.gmra.mrb[0].mxu0 %vm38_vm0, %v397_v35  ;;  %v1220_v14 = vpack.c.bf16 %v788_v13, %v787_v12  ;;  %1155 = vmatprep.mubr.msk.f32.mxu1 %vm1356_vm1, %v1354_v0  ;;  %v991_v25 = vld [vmem:[%s1584_s4] ss:$0 sm:$0xff] }
  0x5f   :  { %1185 = vmatpush3.bf16.msra.mxu0 %v1182_v29  ;;  %1092 = vmatprep.mubr.msk.f32.mxu0 %vm38_vm0, %v398_v37  ;;  %vm750_vm2 = vcmp.le.s32.totalorder %v743_v23, %v991_v25  ;;  %vm749_vm3 = vcmp.le.s32.totalorder %v742_v20, %v991_v25  ;;  %v992_v58 = vld [vmem:[%s1586_s6] ss:$0 sm:$0xff]  ;;  %s1291_s6 = scalar_lea.vmem %s891_s23, 32 }
  0x60   :  { %1187 = vmatprep.subr.bf16.mxu0 %v1186_v38  ;;  %1203 = vmatpush3.bf16.msra.mxu1 %v1202_v59  ;;  %p1292_p9 = scmp.ne.s32.totalorder %s891_s23, %s1291_s6  ;;  %p1297_p11 = scmp.lt.s32.totalorder %s1291_s6, %s1291_s6 }
  0x61   :  { %1204 = vmatprep.subr.bf16.mxu1 %v1355_v39 }
  0x62   :  { %1093 = vmatmul.mubr.msk.f32.gmra.mrb[2].mxu0 %vm38_vm0, %v399_v44  ;;  %p1298_p12 = por %p1297_p11, %p1296_p10 }
  0x63   :  { %1189 = vmatpush3.bf16.msra.mxu0 %v1186_v38  ;;  %1103 = vmatprep.mubr.msk.f32.mxu0 %vm38_vm0, %v506_v45 }
  0x64   :  { %1191 = vmatprep.subr.bf16.mxu0 %v1190_v46  ;;  %1206 = vmatpush3.bf16.msra.mxu1 %v1205_v62  ;;  %p1299_p13 = pnand %p1298_p12, %p1292_p9 }
  0x65   :  { %1207 = vmatprep.subr.bf16.mxu1 %v1355_v39 }
  0x66   :  { %1104 = vmatmul.mubr.msk.f32.vlgmr.msra.gmra.mrb[0].mxu0 %vm38_vm0, %v507_v49 }
  0x67   :  { %1193 = vmatpush3.bf16.msra.mxu0 %v1190_v46  ;;  %1106 = vmatprep.mubr.msk.f32.mxu0 %vm38_vm0, %v508_v50 }
  0x68   :  { %1195 = vmatprep.subr.bf16.mxu0 %v1194_v51  ;;  %1209 = vmatpush3.bf16.msra.mxu1 %v1208_v2 }
  0x69   :  { %1210 = vmatprep.subr.bf16.mxu1 %v1355_v39 }
  0x6a   :  { %1107 = vmatmul.mubr.msk.f32.gmra.mrb[2].mxu0 %vm38_vm0, %v509_v52 }
  0x6b   :  { %1197 = vmatpush3.bf16.msra.mxu0 %v1194_v51  ;;  %1117 = vmatprep.mubr.msk.f32.mxu0 %vm38_vm0, %v616_v53 }
  0x6c   :  { %1212 = vmatpush3.bf16.msra.mxu1 %v1211_v5 }
  0x6d   :  { %1213 = vmatprep.subr.bf16.mxu1 %v1355_v39 }
  0x6e   :  { %1118 = vmatmul.mubr.msk.f32.vlgmr.msra.gmra.mrb[0].mxu0 %vm38_vm0, %v617_v54 }
  0x6f   :  { %1120 = vmatprep.mubr.msk.f32.mxu0 %vm38_vm0, %v618_v55 }
  0x70   :  { %1215 = vmatpush3.bf16.msra.mxu1 %v1214_v8 }
  0x71   :  { %1216 = vmatprep.subr.bf16.mxu1 %v1355_v39 }
  0x72   :  { %1121 = vmatmul.mubr.msk.f32.gmra.mrb[2].mxu0 %vm38_vm0, %v619_v56 }
  0x74   :  { %1218 = vmatpush3.bf16.msra.mxu1 %v1217_v11 }
  0x75   :  { %1219 = vmatprep.subr.bf16.mxu1 %v1355_v39 }
  0x78   :  { %1221 = vmatpush3.bf16.msra.mxu1 %v1220_v14 }
 0x12c   :  { %v1063_v15 = vpop.f32.mrb[0].mxu1 }
 0x12d   :  { %v280_v16 = vpop.f32.mrb[1].mxu1 }
 0x130   :  { %v1066_v17 = vpop.f32.mrb[2].mxu1 }
 0x131   :  { %v290_v18 = vpop.f32.mrb[3].mxu1 }
 0x141   :  { %v1119_v21 = vpop.f32.mrb[0].mxu0 }
 0x142   :  { %v1222_v24 = vadd.f32 %v1119_v21, %v1063_v15  ;;  %v703_v26 = vpop.f32.mrb[1].mxu0 }
 0x143   :  { %v1223_v0 = vadd.f32 %v703_v26, %v280_v16 }
 0x144   :  { %v734_v27 = vadd.f32 %v1222_v24, %v990_v22 }
 0x145   :  { %v733_v28 = vadd.f32 %v1223_v0, %v990_v22  ;;  %v1122_v29 = vpop.f32.mrb[2].mxu0 }
 0x146   :  { %v738_v30 = vmax.f32 %v734_v27, 0.0  ;;  %v1224_v31 = vadd.f32 %v1122_v29, %v1066_v17  ;;  %v713_v32 = vpop.f32.mrb[3].mxu0 }
 0x147   :  { %v737_v33 = vmax.f32 %v733_v28, 0.0  ;;  %v1225_v34 = vadd.f32 %v713_v32, %v290_v18 }
 0x148   :  { %v756_v35 = vsel %vm750_vm2, %v738_v30, 0.0  ;;  %v736_v36 = vadd.f32 %v1224_v31, %v990_v22 }
 0x149   :  { %v755_v37 = vsel %vm749_vm3, %v737_v33, 0.0  ;;  %v735_v38 = vadd.f32 %v1225_v34, %v990_v22 }
 0x14a   :  { %v759_v39 = vmax.f32 %v755_v37, %v756_v35  ;;  %v740_v40 = vmax.f32 %v736_v36, 0.0 }
 0x14b   :  { %v739_v41 = vmax.f32 %v735_v38, 0.0 }
 0x14c   :  { %v760_v42 = vrot.slane %v759_v39, 4  ;;  %v758_v43 = vsel %vm750_vm2, %v740_v40, 0.0 }
 0x14d   :  { %v757_v44 = vsel %vm749_vm3, %v739_v41, 0.0 }
 0x14e   :  { %v761_v45 = vmax.f32 %v759_v39, %v760_v42  ;;  %v766_v46 = vmax.f32 %v757_v44, %v758_v43 }
 0x150   :  { %v762_v47 = vrot.slane %v761_v45, 2  ;;  %v767_v48 = vrot.slane %v766_v46, 4 }
 0x152   :  { %v763_v49 = vmax.f32 %v761_v45, %v762_v47  ;;  %v768_v50 = vmax.f32 %v766_v46, %v767_v48 }
 0x154   :  { %v769_v51 = vrot.slane %v768_v50, 2  ;;  %v764_v52 = vrot.slane %v763_v49, 1 }
 0x156   :  { %v770_v53 = vmax.f32 %v768_v50, %v769_v51  ;;  %v765_v55 = vmax.f32 %v763_v49, %v764_v52 }
 0x158   :  { %v771_v54 = vrot.slane %v770_v53, 1 }
 0x15a   :  { %v772_v56 = vmax.f32 %v770_v53, %v771_v54 }
 0x15c   :  { %v799_v57 = vsel %vm798_vm4, %v772_v56, %v765_v55 }
 0x15d   :  { %1156 = vmatmul.mubr.f32.vlgmr.msra.gmra.mrb[4].mxu1 %v799_v57 }
 0x230   :  { %v867_v59 = vpop.f32.mrb[4].mxu1 }
 0x231   :  { %v868_v60 = vadd.f32 %v992_v58, %v867_v59  ;;  %v1157_v61 = vpop.f32.mrb[5].mxu1 }
 0x233   :  { %v872_v62 = vsel %vm871_vm5, %v868_v60, -inf }
 0x234   :  { %873 = vmax.xlane.f32.xlu0 %v872_v62 }
 0x2c1   :  { %v874_v63 = vpop.xlane.xlu0 %873 }
 0x2c2   :  { %v875_v1 = vsub.f32 %v868_v60, %v874_v63 }
 0x2c4   :  { %v876_v2 = vmul.f32 1.442695, %v875_v1 }
 0x2c6   :  { %1275 = vpow2.f32 %v876_v2 }
 0x2d0   :  { %v1276_v3 = vpop.eup %1275 }
 0x2d1   :  { %v878_v4 = vsel %vm871_vm5, %v1276_v3, 0.0 }
 0x2d2   :  { %879 = vadd.xlane.f32.xlu0 %v878_v4 }
 0x35f   :  { %v880_v5 = vpop.xlane.xlu0 %879 }
 0x360   :  { %1277 = vrcp.f32 %v880_v5 }
 0x36a   :  { %v1278_v6 = vpop.eup %1277 }
 0x36b   :  { %v882_v7 = vmul.f32 %v1278_v6, %v1276_v3 }
 0x36d   :  { %883 = vst.msk [vmem:[#allocation7] sm:$0x3] %vm871_vm5, %v882_v7 }
 0x36e   :  { %1302 = shalt.err (!%p1299_p13)
}
 0x36f   :  { %s1303_s25 = scalar_lea.hbm %s1587_s7, 32 }
 0x370   :  { %p1304_p0 = scmp.ne.s32.totalorder %s1587_s7, %s1303_s25  ;;  %p1307_p1 = scmp.lt.u32.totalorder %s1303_s25, %s1587_s7 }
 0x372   :  { %p1309_p2 = pnand %p1307_p1, %p1304_p0 }
 0x374   :  { %1312 = shalt.err (!%p1309_p2)
}
 0x375   :  { %893 = dma.vmem_to_hbm [thread:$0]  %s891_s23, 32, %s1587_s7, [#allocation5]  }
 0x376   :  { %1335 = dma.done.wait [#allocation5], 32  }
 0x377   :  { %1336 = vsyncadd [#allocation5], 4294967264 }
 0x378   :  { %897 = vsyncpa [#allocation5], 1 }
 0x379   :  { %898 = vsyncpa [#allocation6], 1 }
 0x37a   :  { %899 = vsyncmov [#allocation3] }
 0x37d   :  { %s900_s8 = vpop.sfrf %899 }
 0x37e   :  { %p993_p3 = scmp.ne.s32.totalorder %s900_s8, 0 }
 0x380   :  { %904 = shalt.err (%p993_p3)  }

</bundles_post_ra>
